<compile_context>
chip_gen: v7x
topology: tpu7x:2x2x1
jax: 0.10.0
libtpu: 0.0.40
codegen_flags: <defaults>
</compile_context>

<pallas_src>
from functools import partial

import jax
import jax.numpy as jnp
from jax.experimental import pallas as pl
from jax.experimental.pallas import tpu as pltpu

HIDDEN = 256


def vae_forward_kernel(
    x_ref, eps_ref,
    w_enc1_ref, b_enc1_ref,
    w_head_ref, b_head_ref,
    w_dec1_ref, b_dec1_ref,
    w_dec2_ref, b_dec2_ref,
    xhat_ref, mu_ref, logvar_ref,
    *, latent,
):
    # Activations arrive in caller dtype; MXU inputs are cast to bf16 in-kernel
    # (VPU cast, no extra HBM pass).  MXU accumulates fp32; elementwise math is
    # fp32 (v5e-safe: no bf16 VPU/EUP there).
    x = x_ref[...].astype(jnp.bfloat16)        # [TM, D]
    eps = eps_ref[...].astype(jnp.float32)     # [TM, L]

    # ---- encode ----
    h = jnp.dot(x, w_enc1_ref[...], preferred_element_type=jnp.float32)
    h = jnp.maximum(h + b_enc1_ref[...], 0.0)                      # ReLU, fp32

    # fused mu|log_var head: one [256, 2L] matmul, split before the stores
    head = jnp.dot(h.astype(jnp.bfloat16), w_head_ref[...],
                   preferred_element_type=jnp.float32) + b_head_ref[...]
    mu = head[:, :latent]
    log_var = head[:, latent:]

    # ---- reparameterize: z = eps * exp(log_var / 2) + mu (fp32) ----
    z = eps * jnp.exp(log_var * 0.5) + mu

    # ---- decode ----
    hd = jnp.dot(z.astype(jnp.bfloat16), w_dec1_ref[...],
                 preferred_element_type=jnp.float32) + b_dec1_ref[...]
    hd = jnp.maximum(hd, 0.0)
    x_hat = jnp.dot(hd.astype(jnp.bfloat16), w_dec2_ref[...],
                    preferred_element_type=jnp.float32) + b_dec2_ref[...]
    x_hat = jnp.maximum(x_hat, 0.0)

    xhat_ref[...] = x_hat.astype(xhat_ref.dtype)
    mu_ref[...] = mu.astype(mu_ref.dtype)
    logvar_ref[...] = log_var.astype(logvar_ref.dtype)


def pack_params(params):
    """One-time weight prep (hoisted out of the per-call path).

    bf16 weights for the MXU, fp32 biases, mu|var head fused into one matrix.
    """
    bf16, f32 = jnp.bfloat16, jnp.float32
    return dict(
        w_enc1=params["w_enc1"].astype(bf16),                                       # [D, H]
        b_enc1=params["b_enc1"].astype(f32),                                        # [1, H]
        w_head=jnp.concatenate([params["w_mu"], params["w_var"]], 1).astype(bf16),  # [H, 2L]
        b_head=jnp.concatenate([params["b_mu"], params["b_var"]], 1).astype(f32),   # [1, 2L]
        w_dec1=params["w_dec1"].astype(bf16),                                       # [L, H]
        b_dec1=params["b_dec1"].astype(f32),                                        # [1, H]
        w_dec2=params["w_dec2"].astype(bf16),                                       # [H, D]
        b_dec2=params["b_dec2"].astype(f32),                                        # [1, D]
    )


def _round_up(n, m):
    return ((n + m - 1) // m) * m


def _choose_tm(batch, tm_max=512):
    """Batch tile heuristic.

    Big enough to amortize the ~0.35us/step grid overhead and fill the 256-row
    MXU rows on v6e/v7x (tm>=256 whenever batch>=512), but split into >=2 grid
    blocks when possible so both v7x TensorCores get work.  Always a multiple
    of 8 (sublane constraint).
    """
    half = -(-batch // 2)                       # ceil(batch / 2)
    return max(8, min(tm_max, _round_up(half, 8)))


def _resident_spec(shape):
    """Constant index_map -> DMA'd once, VMEM-resident across all grid steps.

    Single-buffered (the block never changes), saving ~320 KiB of VMEM; falls
    back to the default spec if this jax version lacks pipeline_mode.
    """
    index_map = lambda i: (0,) * len(shape)
    try:
        return pl.BlockSpec(shape, index_map, pipeline_mode=pl.Buffered(1))
    except (TypeError, AttributeError):
        return pl.BlockSpec(shape, index_map)


@partial(jax.jit, static_argnames=("tm", "out_dtype"))
def vae_forward(x, eps, packed, *, tm=None, out_dtype=jnp.bfloat16):
    """Full VAE forward in one Pallas kernel, tiled over the batch.

    `packed` is the output of pack_params().  Returns (x_hat, x, mu, log_var)
    matching the PyTorch module's forward(); x_hat/mu/log_var use `out_dtype`.
    """
    B, D = x.shape
    L = eps.shape[1]

    tm = tm if tm is not None else _choose_tm(B)
    B_pad = pl.cdiv(B, tm) * tm

    x_in = x
    if B_pad != B:
        # Ragged tail only; callers with B % tm == 0 pay no padding copies.
        x = jnp.pad(x, ((0, B_pad - B), (0, 0)))
        eps = jnp.pad(eps, ((0, B_pad - B), (0, 0)))

    def row_spec(width):
        # batch-tiled operand / output; feature dims use the full (unpadded)
        # array extent so no wrapper-side lane padding is needed.
        return pl.BlockSpec((tm, width), lambda i: (i, 0))

    weights = (packed["w_enc1"], packed["b_enc1"],
               packed["w_head"], packed["b_head"],
               packed["w_dec1"], packed["b_dec1"],
               packed["w_dec2"], packed["b_dec2"])

    in_specs = [row_spec(D), row_spec(L)] + [_resident_spec(w.shape) for w in weights]

    x_hat, mu, log_var = pl.pallas_call(
        partial(vae_forward_kernel, latent=L),
        out_shape=(
            jax.ShapeDtypeStruct((B_pad, D), out_dtype),   # x_hat
            jax.ShapeDtypeStruct((B_pad, L), out_dtype),   # mu
            jax.ShapeDtypeStruct((B_pad, L), out_dtype),   # log_var
        ),
        grid=(B_pad // tm,),
        in_specs=in_specs,
        out_specs=(row_spec(D), row_spec(L), row_spec(L)),
        compiler_params=pltpu.CompilerParams(
            dimension_semantics=("parallel",),      # batch tiles shard across TCs (v7x)
            vmem_limit_bytes=32 * 1024 * 1024,      # actual need << 32 MiB; below v7x ceiling
        ),
    )(x, eps, *weights)

    if B_pad != B:
        x_hat, mu, log_var = x_hat[:B], mu[:B], log_var[:B]
    return x_hat, x_in, mu, log_var


def init_params(key, input_dim, hidden=256, latent=128):
    """Deterministic parameter init (same shapes as the PyTorch module)."""
    ks = jax.random.split(key, 10)

    def linear(kw, kb, fan_in, fan_out):
        # stored as [in, out] (transposed vs PyTorch's [out, in])
        bound = 1.0 / jnp.sqrt(fan_in)
        w = jax.random.uniform(kw, (fan_in, fan_out), jnp.float32, -bound, bound)
        b = jax.random.uniform(kb, (1, fan_out), jnp.float32, -bound, bound)
        return w, b

    w_enc1, b_enc1 = linear(ks[0], ks[1], input_dim, hidden)   # enc_1
    w_mu, b_mu = linear(ks[2], ks[3], hidden, latent)          # mu
    w_var, b_var = linear(ks[4], ks[5], hidden, latent)        # var
    w_dec1, b_dec1 = linear(ks[6], ks[7], latent, hidden)      # dec_1
    w_dec2, b_dec2 = linear(ks[8], ks[9], hidden, input_dim)   # dec_2

    return dict(
        w_enc1=w_enc1, b_enc1=b_enc1,
        w_mu=w_mu, b_mu=b_mu,
        w_var=w_var, b_var=b_var,
        w_dec1=w_dec1, b_dec1=b_dec1,
        w_dec2=w_dec2, b_dec2=b_dec2,
    )


def vae_forward_ref(x, eps, p):
    """Pure-JAX fp32 reference of the PyTorch forward, for correctness checking."""
    h = jnp.maximum(x @ p["w_enc1"] + p["b_enc1"], 0.0)
    mu = h @ p["w_mu"] + p["b_mu"]
    log_var = h @ p["w_var"] + p["b_var"]
    z = eps * jnp.exp(log_var / 2.0) + mu
    hd = jnp.maximum(z @ p["w_dec1"] + p["b_dec1"], 0.0)
    x_hat = jnp.maximum(hd @ p["w_dec2"] + p["b_dec2"], 0.0)
    return x_hat, x, mu, log_var


if __name__ == "__main__":
    B = 8           # small batch (single tiny tile)
    INPUT_DIM = 64  # flattened input features
    LATENT = 128    # module default

    key = jax.random.PRNGKey(0)
    k_params, k_x, k_eps = jax.random.split(key, 3)

    params = init_params(k_params, INPUT_DIM, HIDDEN, LATENT)
    packed = pack_params(params)     # one-time weight prep (hoisted out of forward)

    x = jax.random.normal(k_x, (B, INPUT_DIM), dtype=jnp.float32)
    eps = jax.random.normal(k_eps, (B, LATENT), dtype=jnp.float32)

    x_hat, x_out, mu, log_var = jax.block_until_ready(vae_forward(x, eps, packed))

    # correctness vs pure-JAX fp32 reference (tolerances acknowledge the bf16
    # MXU inputs and bf16 output stores)
    r_xhat, _, r_mu, r_logvar = vae_forward_ref(x, eps, params)
    assert x_out.shape == x.shape and x_out.dtype == x.dtype
    assert jnp.allclose(mu.astype(jnp.float32), r_mu, atol=5e-2, rtol=5e-2)
    assert jnp.allclose(log_var.astype(jnp.float32), r_logvar, atol=5e-2, rtol=5e-2)
    assert jnp.allclose(x_hat.astype(jnp.float32), r_xhat, atol=5e-2, rtol=5e-2)

    # multi-tile grid + ragged tail (B not a multiple of the chosen tile)
    B2 = 300
    x2 = jax.random.normal(jax.random.PRNGKey(1), (B2, INPUT_DIM), dtype=jnp.float32)
    eps2 = jax.random.normal(jax.random.PRNGKey(2), (B2, LATENT), dtype=jnp.float32)
    x_hat2, _, mu2, lv2 = jax.block_until_ready(vae_forward(x2, eps2, packed))
    r_xhat2, _, r_mu2, r_lv2 = vae_forward_ref(x2, eps2, params)
    assert jnp.allclose(mu2.astype(jnp.float32), r_mu2, atol=5e-2, rtol=5e-2)
    assert jnp.allclose(lv2.astype(jnp.float32), r_lv2, atol=5e-2, rtol=5e-2)
    assert jnp.allclose(x_hat2.astype(jnp.float32), r_xhat2, atol=5e-2, rtol=5e-2)

    print("KERNEL_OK")
</pallas_src>

<mosaic_0001>
module attributes {stable_mosaic.version = 11 : i64} {
  func.func @vae_forward_kernel(%arg0: i32, %arg1: memref<8x64xf32, #tpu.memory_space<vmem>>, %arg2: memref<8x128xf32, #tpu.memory_space<vmem>>, %arg3: memref<64x256xbf16, #tpu.memory_space<vmem>>, %arg4: memref<1x256xf32, #tpu.memory_space<vmem>>, %arg5: memref<256x256xbf16, #tpu.memory_space<vmem>>, %arg6: memref<1x256xf32, #tpu.memory_space<vmem>>, %arg7: memref<128x256xbf16, #tpu.memory_space<vmem>>, %arg8: memref<1x256xf32, #tpu.memory_space<vmem>>, %arg9: memref<256x64xbf16, #tpu.memory_space<vmem>>, %arg10: memref<1x64xf32, #tpu.memory_space<vmem>>, %arg11: memref<8x64xbf16, #tpu.memory_space<vmem>>, %arg12: memref<8x128xbf16, #tpu.memory_space<vmem>>, %arg13: memref<8x128xbf16, #tpu.memory_space<vmem>>) attributes {dimension_semantics = [#tpu.dimension_semantics<parallel>], iteration_bounds = array<i64: 1>, scalar_prefetch = 0 : i64, scratch_operands = 0 : i64, tpu.core_type = #tpu.core_type<tc>, window_params = [{transform_indices = @transform_0, window_bounds = array<i64: 8, 64>}, {transform_indices = @transform_1, window_bounds = array<i64: 8, 128>}, {pipeline_mode = #tpu.pipeline_mode<synchronous>, transform_indices = @transform_2, window_bounds = array<i64: 64, 256>}, {pipeline_mode = #tpu.pipeline_mode<synchronous>, transform_indices = @transform_3, window_bounds = array<i64: 1, 256>}, {pipeline_mode = #tpu.pipeline_mode<synchronous>, transform_indices = @transform_4, window_bounds = array<i64: 256, 256>}, {pipeline_mode = #tpu.pipeline_mode<synchronous>, transform_indices = @transform_5, window_bounds = array<i64: 1, 256>}, {pipeline_mode = #tpu.pipeline_mode<synchronous>, transform_indices = @transform_6, window_bounds = array<i64: 128, 256>}, {pipeline_mode = #tpu.pipeline_mode<synchronous>, transform_indices = @transform_7, window_bounds = array<i64: 1, 256>}, {pipeline_mode = #tpu.pipeline_mode<synchronous>, transform_indices = @transform_8, window_bounds = array<i64: 256, 64>}, {pipeline_mode = #tpu.pipeline_mode<synchronous>, transform_indices = @transform_9, window_bounds = array<i64: 1, 64>}, {transform_indices = @transform_10, window_bounds = array<i64: 8, 64>}, {transform_indices = @transform_11, window_bounds = array<i64: 8, 128>}, {transform_indices = @transform_12, window_bounds = array<i64: 8, 128>}]} {
    %c0 = arith.constant 0 : index
    %c0_0 = arith.constant 0 : index
    %0 = vector.load %arg1[%c0, %c0_0] : memref<8x64xf32, #tpu.memory_space<vmem>>, vector<8x64xf32>
    %1 = arith.truncf %0 : vector<8x64xf32> to vector<8x64xbf16>
    %c0_1 = arith.constant 0 : index
    %c0_2 = arith.constant 0 : index
    %2 = vector.load %arg2[%c0_1, %c0_2] : memref<8x128xf32, #tpu.memory_space<vmem>>, vector<8x128xf32>
    %c0_3 = arith.constant 0 : index
    %c0_4 = arith.constant 0 : index
    %3 = vector.load %arg3[%c0_3, %c0_4] : memref<64x256xbf16, #tpu.memory_space<vmem>>, vector<64x256xbf16>
    %cst = arith.constant dense<0.000000e+00> : vector<8x256xf32>
    %4 = tpu.matmul %1, %3, %cst {dimension_numbers = #tpu.dot_dimension_numbers<[1], [0], [0], [1], [0, 0, 1, 1], [], []>} : vector<8x64xbf16>, vector<64x256xbf16>, vector<8x256xf32> -> vector<8x256xf32>
    %c0_5 = arith.constant 0 : index
    %c0_6 = arith.constant 0 : index
    %5 = vector.load %arg4[%c0_5, %c0_6] : memref<1x256xf32, #tpu.memory_space<vmem>>, vector<1x256xf32>
    %6 = vector.broadcast %5 : vector<1x256xf32> to vector<8x256xf32>
    %7 = arith.addf %4, %6 : vector<8x256xf32>
    %cst_7 = arith.constant 0.000000e+00 : f32
    %8 = vector.broadcast %cst_7 : f32 to vector<8x256xf32>
    %9 = arith.maximumf %7, %8 : vector<8x256xf32>
    %10 = arith.truncf %9 : vector<8x256xf32> to vector<8x256xbf16>
    %c0_8 = arith.constant 0 : index
    %c0_9 = arith.constant 0 : index
    %11 = vector.load %arg5[%c0_8, %c0_9] : memref<256x256xbf16, #tpu.memory_space<vmem>>, vector<256x256xbf16>
    %cst_10 = arith.constant dense<0.000000e+00> : vector<8x256xf32>
    %12 = tpu.matmul %10, %11, %cst_10 {dimension_numbers = #tpu.dot_dimension_numbers<[1], [0], [0], [1], [0, 0, 1, 1], [], []>} : vector<8x256xbf16>, vector<256x256xbf16>, vector<8x256xf32> -> vector<8x256xf32>
    %c0_11 = arith.constant 0 : index
    %c0_12 = arith.constant 0 : index
    %13 = vector.load %arg6[%c0_11, %c0_12] : memref<1x256xf32, #tpu.memory_space<vmem>>, vector<1x256xf32>
    %14 = vector.broadcast %13 : vector<1x256xf32> to vector<8x256xf32>
    %15 = arith.addf %12, %14 : vector<8x256xf32>
    %16 = vector.extract_strided_slice %15 {offsets = [0, 0], sizes = [8, 128], strides = [1, 1]} : vector<8x256xf32> to vector<8x128xf32>
    %17 = vector.extract_strided_slice %15 {offsets = [0, 128], sizes = [8, 128], strides = [1, 1]} : vector<8x256xf32> to vector<8x128xf32>
    %cst_13 = arith.constant 5.000000e-01 : f32
    %18 = vector.broadcast %cst_13 : f32 to vector<8x128xf32>
    %19 = arith.mulf %17, %18 : vector<8x128xf32>
    %20 = math.exp %19 : vector<8x128xf32>
    %21 = arith.mulf %2, %20 : vector<8x128xf32>
    %22 = arith.addf %21, %16 : vector<8x128xf32>
    %23 = arith.truncf %22 : vector<8x128xf32> to vector<8x128xbf16>
    %c0_14 = arith.constant 0 : index
    %c0_15 = arith.constant 0 : index
    %24 = vector.load %arg7[%c0_14, %c0_15] : memref<128x256xbf16, #tpu.memory_space<vmem>>, vector<128x256xbf16>
    %cst_16 = arith.constant dense<0.000000e+00> : vector<8x256xf32>
    %25 = tpu.matmul %23, %24, %cst_16 {dimension_numbers = #tpu.dot_dimension_numbers<[1], [0], [0], [1], [0, 0, 1, 1], [], []>} : vector<8x128xbf16>, vector<128x256xbf16>, vector<8x256xf32> -> vector<8x256xf32>
    %c0_17 = arith.constant 0 : index
    %c0_18 = arith.constant 0 : index
    %26 = vector.load %arg8[%c0_17, %c0_18] : memref<1x256xf32, #tpu.memory_space<vmem>>, vector<1x256xf32>
    %27 = vector.broadcast %26 : vector<1x256xf32> to vector<8x256xf32>
    %28 = arith.addf %25, %27 : vector<8x256xf32>
    %cst_19 = arith.constant 0.000000e+00 : f32
    %29 = vector.broadcast %cst_19 : f32 to vector<8x256xf32>
    %30 = arith.maximumf %28, %29 : vector<8x256xf32>
    %31 = arith.truncf %30 : vector<8x256xf32> to vector<8x256xbf16>
    %c0_20 = arith.constant 0 : index
    %c0_21 = arith.constant 0 : index
    %32 = vector.load %arg9[%c0_20, %c0_21] : memref<256x64xbf16, #tpu.memory_space<vmem>>, vector<256x64xbf16>
    %cst_22 = arith.constant dense<0.000000e+00> : vector<8x64xf32>
    %33 = tpu.matmul %31, %32, %cst_22 {dimension_numbers = #tpu.dot_dimension_numbers<[1], [0], [0], [1], [0, 0, 1, 1], [], []>} : vector<8x256xbf16>, vector<256x64xbf16>, vector<8x64xf32> -> vector<8x64xf32>
    %c0_23 = arith.constant 0 : index
    %c0_24 = arith.constant 0 : index
    %34 = vector.load %arg10[%c0_23, %c0_24] : memref<1x64xf32, #tpu.memory_space<vmem>>, vector<1x64xf32>
    %35 = vector.broadcast %34 : vector<1x64xf32> to vector<8x64xf32>
    %36 = arith.addf %33, %35 : vector<8x64xf32>
    %cst_25 = arith.constant 0.000000e+00 : f32
    %37 = vector.broadcast %cst_25 : f32 to vector<8x64xf32>
    %38 = arith.maximumf %36, %37 : vector<8x64xf32>
    %39 = arith.truncf %38 : vector<8x64xf32> to vector<8x64xbf16>
    %c0_26 = arith.constant 0 : index
    %c0_27 = arith.constant 0 : index
    %40 = vector.load %arg11[%c0_26, %c0_27] : memref<8x64xbf16, #tpu.memory_space<vmem>>, vector<8x64xbf16>
    tpu.vector_store %arg11[%c0_26, %c0_27], %39 {strides = array<i32>} : memref<8x64xbf16, #tpu.memory_space<vmem>>, vector<8x64xbf16>,
    %41 = arith.truncf %16 : vector<8x128xf32> to vector<8x128xbf16>
    %c0_28 = arith.constant 0 : index
    %c0_29 = arith.constant 0 : index
    %42 = vector.load %arg12[%c0_28, %c0_29] : memref<8x128xbf16, #tpu.memory_space<vmem>>, vector<8x128xbf16>
    tpu.vector_store %arg12[%c0_28, %c0_29], %41 {strides = array<i32>} : memref<8x128xbf16, #tpu.memory_space<vmem>>, vector<8x128xbf16>,
    %43 = arith.truncf %17 : vector<8x128xf32> to vector<8x128xbf16>
    %c0_30 = arith.constant 0 : index
    %c0_31 = arith.constant 0 : index
    %44 = vector.load %arg13[%c0_30, %c0_31] : memref<8x128xbf16, #tpu.memory_space<vmem>>, vector<8x128xbf16>
    tpu.vector_store %arg13[%c0_30, %c0_31], %43 {strides = array<i32>} : memref<8x128xbf16, #tpu.memory_space<vmem>>, vector<8x128xbf16>,
    return
  }
  func.func @transform_0(%arg0: i32) -> (i32, i32) {
    %c0_i32 = arith.constant 0 : i32
    %c0_i32_0 = arith.constant 0 : i32
    return %arg0, %c0_i32 : i32, i32
  }
  func.func @transform_1(%arg0: i32) -> (i32, i32) {
    %c0_i32 = arith.constant 0 : i32
    %c0_i32_0 = arith.constant 0 : i32
    return %arg0, %c0_i32 : i32, i32
  }
  func.func @transform_2(%arg0: i32) -> (i32, i32) {
    %c0_i32 = arith.constant 0 : i32
    %c0_i32_0 = arith.constant 0 : i32
    %c0_i32_1 = arith.constant 0 : i32
    return %c0_i32, %c0_i32_0 : i32, i32
  }
  func.func @transform_3(%arg0: i32) -> (i32, i32) {
    %c0_i32 = arith.constant 0 : i32
    %c0_i32_0 = arith.constant 0 : i32
    %c0_i32_1 = arith.constant 0 : i32
    return %c0_i32, %c0_i32_0 : i32, i32
  }
  func.func @transform_4(%arg0: i32) -> (i32, i32) {
    %c0_i32 = arith.constant 0 : i32
    %c0_i32_0 = arith.constant 0 : i32
    %c0_i32_1 = arith.constant 0 : i32
    return %c0_i32, %c0_i32_0 : i32, i32
  }
  func.func @transform_5(%arg0: i32) -> (i32, i32) {
    %c0_i32 = arith.constant 0 : i32
    %c0_i32_0 = arith.constant 0 : i32
    %c0_i32_1 = arith.constant 0 : i32
    return %c0_i32, %c0_i32_0 : i32, i32
  }
  func.func @transform_6(%arg0: i32) -> (i32, i32) {
    %c0_i32 = arith.constant 0 : i32
    %c0_i32_0 = arith.constant 0 : i32
    %c0_i32_1 = arith.constant 0 : i32
    return %c0_i32, %c0_i32_0 : i32, i32
  }
  func.func @transform_7(%arg0: i32) -> (i32, i32) {
    %c0_i32 = arith.constant 0 : i32
    %c0_i32_0 = arith.constant 0 : i32
    %c0_i32_1 = arith.constant 0 : i32
    return %c0_i32, %c0_i32_0 : i32, i32
  }
  func.func @transform_8(%arg0: i32) -> (i32, i32) {
    %c0_i32 = arith.constant 0 : i32
    %c0_i32_0 = arith.constant 0 : i32
    %c0_i32_1 = arith.constant 0 : i32
    return %c0_i32, %c0_i32_0 : i32, i32
  }
  func.func @transform_9(%arg0: i32) -> (i32, i32) {
    %c0_i32 = arith.constant 0 : i32
    %c0_i32_0 = arith.constant 0 : i32
    %c0_i32_1 = arith.constant 0 : i32
    return %c0_i32, %c0_i32_0 : i32, i32
  }
  func.func @transform_10(%arg0: i32) -> (i32, i32) {
    %c0_i32 = arith.constant 0 : i32
    %c0_i32_0 = arith.constant 0 : i32
    return %arg0, %c0_i32 : i32, i32
  }
  func.func @transform_11(%arg0: i32) -> (i32, i32) {
    %c0_i32 = arith.constant 0 : i32
    %c0_i32_0 = arith.constant 0 : i32
    return %arg0, %c0_i32 : i32, i32
  }
  func.func @transform_12(%arg0: i32) -> (i32, i32) {
    %c0_i32 = arith.constant 0 : i32
    %c0_i32_0 = arith.constant 0 : i32
    return %arg0, %c0_i32 : i32, i32
  }
}

</mosaic_0001>

<bundles_post_ra>
// kernel: vae_forward.1
= control target key start
LH: loop header
LB: loop body
LE: loop exit
PB: predicated region body
PF: predicated region fallthrough
CT: control target
= control target key end

     0   :  { %18 = vsyncpa [#allocation3], 0  ;;  %s1411_s0 = inlined_call_operand.vmem [shape: f32[8,64], index: 0, kind: input, shape index: {}]   ;;  %s1412_s1 = inlined_call_operand.vmem [shape: f32[8,128], index: 1, kind: input, shape index: {}]   ;;  %s1413_s2 = inlined_call_operand.vmem [shape: bf16[64,256], index: 2, kind: input, shape index: {}]   ;;  %s1414_s3 = inlined_call_operand.vmem [shape: f32[1,256], index: 3, kind: input, shape index: {}]   ;;  %s1415_s4 = inlined_call_operand.hbm [shape: bf16[256,256], index: 4, kind: input, shape index: {}]   ;;  %s1416_s5 = inlined_call_operand.hbm [shape: f32[1,256], index: 5, kind: input, shape index: {}]   ;;  %s1417_s6 = inlined_call_operand.vmem [shape: bf16[128,256], index: 6, kind: input, shape index: {}]   ;;  %s1418_s7 = inlined_call_operand.vmem [shape: f32[1,256], index: 7, kind: input, shape index: {}]   ;;  %s1419_s8 = inlined_call_operand.vmem [shape: bf16[256,64], index: 8, kind: input, shape index: {}]   ;;  %s1420_s9 = inlined_call_operand.vmem [shape: f32[1,64], index: 9, kind: input, shape index: {}]   ;;  %s1421_s10 = inlined_call_operand.hbm [shape: bf16[8,64], index: 10, kind: output, shape index: {0}]   ;;  %s1422_s11 = inlined_call_operand.hbm [shape: bf16[8,128], index: 11, kind: output, shape index: {1}]   ;;  %s1423_s12 = inlined_call_operand.hbm [shape: bf16[8,128], index: 12, kind: output, shape index: {2}]  }
   0x1   :  { %19 = vsyncpa [#allocation6], 0 }
   0x2   :  { %20 = vsyncpa [#allocation4], 0 }
   0x3   :  { %21 = vsyncpa [#allocation9], 0  ;;  %s1133_s21 = smov [#allocation2]   ;;  %s1015_s25 = scalar_lea.hbm %s1415_s4, 4096 }
   0x4   :  { %s35_s22 = sshll.u32 %s1133_s21, 4  ;;  %p1016_p0 = scmp.ne.s32.totalorder %s1415_s4, %s1015_s25  ;;  %s36_s22 = int_to_ptr.vmem [resolvable:$true] %s35_s22 }
   0x5   :  { %p1019_p1 = scmp.lt.u32.totalorder %s1015_s25, %s1415_s4 }
   0x7   :  { %p1021_p2 = pnand %p1019_p1, %p1016_p0 }
   0x9   :  { %1024 = shalt.err (!%p1021_p2)
}
   0xa   :  { %s1025_s30 = scalar_lea.vmem %s36_s22, 4096  ;;  %p1030_p4 = scmp.lt.s32.totalorder %s36_s22, %s36_s22 }
   0xb   :  { %p1026_p3 = scmp.ne.s32.totalorder %s36_s22, %s1025_s30  ;;  %p1031_p5 = scmp.lt.s32.totalorder %s1025_s30, %s1025_s30 }
   0xd   :  { %p1032_p6 = por %p1031_p5, %p1030_p4 }
   0xf   :  { %p1033_p7 = pnand %p1032_p6, %p1026_p3 }
  0x11   :  { %1036 = shalt.err (!%p1033_p7)
}
  0x12   :  { %s1134_s13 = smov 128   ;;  %s1135_s14 = smov 8  }
  0x13   :  { %41 = dma.hbm_to_vmem [thread:$0]  %s1415_s4, 4096, %s36_s22, [#allocation3], %s1134_s13, %s1134_s13, %s1135_s14  }
  0x14   :  { %s1136_s17 = smov [#allocation5]   ;;  %s1037_s21 = scalar_lea.hbm %s1416_s5, 32 }
  0x15   :  { %s48_s18 = sshll.u32 %s1136_s17, 4  ;;  %p1038_p8 = scmp.ne.s32.totalorder %s1416_s5, %s1037_s21  ;;  %s49_s18 = int_to_ptr.vmem [resolvable:$true] %s48_s18 }
  0x16   :  { %p1041_p9 = scmp.lt.u32.totalorder %s1037_s21, %s1416_s5 }
  0x18   :  { %p1043_p10 = pnand %p1041_p9, %p1038_p8 }
  0x1a   :  { %1046 = shalt.err (!%p1043_p10)
}
  0x1b   :  { %s1047_s27 = scalar_lea.vmem %s49_s18, 32  ;;  %p1052_p12 = scmp.lt.s32.totalorder %s49_s18, %s49_s18 }
  0x1c   :  { %p1048_p11 = scmp.ne.s32.totalorder %s49_s18, %s1047_s27  ;;  %p1053_p13 = scmp.lt.s32.totalorder %s1047_s27, %s1047_s27 }
  0x1e   :  { %p1054_p0 = por %p1053_p13, %p1052_p12 }
  0x20   :  { %p1055_p1 = pnand %p1054_p0, %p1048_p11 }
  0x22   :  { %1058 = shalt.err (!%p1055_p1)
}
  0x23   :  { %51 = dma.hbm_to_vmem [thread:$0]  %s1416_s5, 32, %s49_s18, [#allocation6]  }
  0x24   :  { %1125 = dma.done.wait [#allocation3], 4096  }
  0x25   :  { %1126 = vsyncadd [#allocation3], 4294963200 }
  0x26   :  { %1127 = dma.done.wait [#allocation6], 32  }
  0x27   :  { %1128 = vsyncadd [#allocation6], 4294967264  ;;  %v1137_v0 = vmov 0   ;;  %v913_v1 = vld [vmem:[%s1413_s2 + $0x4] ss:$8 sps:$4 sm:$0xff]   ;;  %vm130_vm0 = vcmask 523264   ;;  %v80_v47 = vlaneseq }
  0x28   :  { %166 = vmatprep.mubr.bf16.mxu0 %v1137_v0  ;;  %v915_v2 = vld [vmem:[%s1413_s2] ss:$8 sps:$4 sm:$0xff]   ;;  %134 = vmatprep.subr.bf16.mxu0 %v913_v1  ;;  %v916_v3 = vld [vmem:[%s1413_s2 + $0x14] ss:$8 sps:$4 sm:$0xff]   ;;  %v918_v4 = vld [vmem:[%s1413_s2 + $0x10] ss:$8 sps:$4 sm:$0xff]  }
  0x29   :  { %135 = vmatpush1.bf16.msra.mxu0 %v915_v2  ;;  %v919_v5 = vld [vmem:[%s1413_s2 + $0x24] ss:$8 sps:$4 sm:$0xff]   ;;  %v921_v6 = vld [vmem:[%s1413_s2 + $0x20] ss:$8 sps:$4 sm:$0xff]   ;;  %v928_v9 = vld [vmem:[#allocation2 + $0x14] ss:$8 sps:$4 sm:$0xff]  }
  0x2a   :  { %136 = vmatprep.subr.bf16.mxu0 %v916_v3  ;;  %v925_v7 = vld [vmem:[#allocation2 + $0x4] ss:$8 sps:$4 sm:$0xff]   ;;  %v927_v8 = vld [vmem:[#allocation2] ss:$8 sps:$4 sm:$0xff]   ;;  %v922_v10 = vld [vmem:[%s1413_s2 + $0x34] ss:$8 sps:$4 sm:$0xff]  }
  0x2b   :  { %383 = vmatprep.subr.bf16.mxu1 %v925_v7  ;;  %v930_v11 = vld [vmem:[#allocation2 + $0x10] ss:$8 sps:$4 sm:$0xff]   ;;  %v931_v13 = vld [vmem:[#allocation2 + $0x24] ss:$8 sps:$4 sm:$0xff]   ;;  %v933_v15 = vld [vmem:[#allocation2 + $0x20] ss:$8 sps:$4 sm:$0xff]  }
  0x2c   :  { %384 = vmatpush1.bf16.msra.mxu1 %v927_v8  ;;  %v924_v12 = vld [vmem:[%s1413_s2 + $0x30] ss:$8 sps:$4 sm:$0xff]   ;;  %v67_v14 = vld [vmem:[%s1411_s0] sm:$0xff]  ;;  %v934_v17 = vld [vmem:[#allocation2 + $0x34] ss:$8 sps:$4 sm:$0xff]   ;;  %v81_v48 = vshrl.u32 %v80_v47, 7 }
  0x2d   :  { %137 = vmatpush1.bf16.msra.mxu0 %v918_v4  ;;  %385 = vmatprep.subr.bf16.mxu1 %v928_v9  ;;  %v68_v16 = vpack.c.bf16 %v67_v14, %v67_v14  ;;  %v936_v18 = vld [vmem:[#allocation2 + $0x30] ss:$8 sps:$4 sm:$0xff]   ;;  %v937_v19 = vld [vmem:[#allocation2 + $0x44] ss:$8 sps:$4 sm:$0xff]   ;;  %v939_v20 = vld [vmem:[#allocation2 + $0x40] ss:$8 sps:$4 sm:$0xff]  }
  0x2e   :  { %138 = vmatprep.subr.bf16.mxu0 %v919_v5  ;;  %v940_v21 = vld [vmem:[#allocation2 + $0x54] ss:$8 sps:$4 sm:$0xff]   ;;  %v942_v22 = vld [vmem:[#allocation2 + $0x50] ss:$8 sps:$4 sm:$0xff]   ;;  %v943_v23 = vld [vmem:[#allocation2 + $0x64] ss:$8 sps:$4 sm:$0xff]  }
  0x2f   :  { %v945_v24 = vld [vmem:[#allocation2 + $0x60] ss:$8 sps:$4 sm:$0xff]   ;;  %v946_v25 = vld [vmem:[#allocation2 + $0x74] ss:$8 sps:$4 sm:$0xff]   ;;  %v948_v26 = vld [vmem:[#allocation2 + $0x70] ss:$8 sps:$4 sm:$0xff]  }
  0x30   :  { %386 = vmatpush1.bf16.msra.mxu1 %v930_v11  ;;  %v949_v27 = vld [vmem:[#allocation2 + $0x84] ss:$8 sps:$4 sm:$0xff]   ;;  %v951_v28 = vld [vmem:[#allocation2 + $0x80] ss:$8 sps:$4 sm:$0xff]   ;;  %v952_v29 = vld [vmem:[#allocation2 + $0x94] ss:$8 sps:$4 sm:$0xff]  }
  0x31   :  { %139 = vmatpush1.bf16.msra.mxu0 %v921_v6  ;;  %387 = vmatprep.subr.bf16.mxu1 %v931_v13  ;;  %v954_v30 = vld [vmem:[#allocation2 + $0x90] ss:$8 sps:$4 sm:$0xff]   ;;  %v955_v31 = vld [vmem:[#allocation2 + $0xa4] ss:$8 sps:$4 sm:$0xff]   ;;  %v957_v32 = vld [vmem:[#allocation2 + $0xa0] ss:$8 sps:$4 sm:$0xff]  }
  0x32   :  { %140 = vmatprep.subr.bf16.mxu0 %v922_v10  ;;  %v958_v33 = vld [vmem:[#allocation2 + $0xb4] ss:$8 sps:$4 sm:$0xff]   ;;  %v960_v34 = vld [vmem:[#allocation2 + $0xb0] ss:$8 sps:$4 sm:$0xff]   ;;  %v961_v35 = vld [vmem:[#allocation2 + $0xc4] ss:$8 sps:$4 sm:$0xff]  }
  0x33   :  { %v963_v36 = vld [vmem:[#allocation2 + $0xc0] ss:$8 sps:$4 sm:$0xff]   ;;  %v964_v37 = vld [vmem:[#allocation2 + $0xd4] ss:$8 sps:$4 sm:$0xff]   ;;  %v966_v38 = vld [vmem:[#allocation2 + $0xd0] ss:$8 sps:$4 sm:$0xff]  }
  0x34   :  { %388 = vmatpush1.bf16.msra.mxu1 %v933_v15  ;;  %v967_v39 = vld [vmem:[#allocation2 + $0xe4] ss:$8 sps:$4 sm:$0xff]   ;;  %v969_v40 = vld [vmem:[#allocation2 + $0xe0] ss:$8 sps:$4 sm:$0xff]   ;;  %v970_v41 = vld [vmem:[#allocation2 + $0xf4] ss:$8 sps:$4 sm:$0xff]  }
  0x35   :  { %141 = vmatpush1.bf16.msra.mxu0 %v924_v12  ;;  %389 = vmatprep.subr.bf16.mxu1 %v934_v17  ;;  %v972_v42 = vld [vmem:[#allocation2 + $0xf0] ss:$8 sps:$4 sm:$0xff]   ;;  %v973_v43 = vld [vmem:[%s1417_s6] ss:$8 sps:$4 sm:$0xff]   ;;  %v975_v44 = vld [vmem:[%s1417_s6 + $0x4] ss:$8 sps:$4 sm:$0xff]  }
  0x36   :  { %v978_v45 = vld [vmem:[%s1417_s6 + $0x14] ss:$8 sps:$4 sm:$0xff]   ;;  %538 = vmatprep.subr.bf16.mxu0 %v975_v44  ;;  %v976_v46 = vld [vmem:[%s1417_s6 + $0x10] ss:$8 sps:$4 sm:$0xff]   ;;  %v1269_v49 = vsub.s32 0, %v81_v48  ;;  %v1274_v51 = vsub.s32 1, %v81_v48 }
  0x37   :  { %v78_v50 = vld [vmem:[%s1414_s3] sm:$0x3]  ;;  %v984_v2 = vld [vmem:[%s1417_s6 + $0x34] ss:$8 sps:$4 sm:$0xff]   ;;  %v982_v3 = vld [vmem:[%s1417_s6 + $0x30] ss:$8 sps:$4 sm:$0xff]  }
  0x38   :  { %817 = vmatmul.mubr.msk.bf16.vlgmr.msra.gmra.mrb[0].mxu0 %vm130_vm0, %v68_v16  ;;  %390 = vmatpush1.bf16.msra.mxu1 %v936_v18  ;;  %v83_v52 = vrot.slane %v78_v50, %v1269_v49  ;;  %v87_v53 = vrot.slane %v78_v50, %v1274_v51  ;;  %v979_v1 = vld [vmem:[%s1417_s6 + $0x20] ss:$8 sps:$4 sm:$0xff]   ;;  %v987_v4 = vld [vmem:[%s1417_s6 + $0x44] ss:$8 sps:$4 sm:$0xff]   ;;  %v990_v6 = vld [vmem:[%s1417_s6 + $0x54] ss:$8 sps:$4 sm:$0xff]  }
  0x39   :  { %570 = vmatprep.mubr.bf16.mxu0 %v1137_v0  ;;  %391 = vmatprep.subr.bf16.mxu1 %v937_v19  ;;  %v981_v0 = vld [vmem:[%s1417_s6 + $0x24] ss:$8 sps:$4 sm:$0xff]   ;;  %v985_v5 = vld [vmem:[%s1417_s6 + $0x40] ss:$8 sps:$4 sm:$0xff]   ;;  %v988_v7 = vld [vmem:[%s1417_s6 + $0x50] ss:$8 sps:$4 sm:$0xff]  }
  0x3a   :  { %539 = vmatpush1.bf16.msra.mxu0 %v973_v43  ;;  %v993_v8 = vld [vmem:[%s1417_s6 + $0x64] ss:$8 sps:$4 sm:$0xff]   ;;  %v991_v9 = vld [vmem:[%s1417_s6 + $0x60] ss:$8 sps:$4 sm:$0xff]   ;;  %v996_v10 = vld [vmem:[%s1417_s6 + $0x74] ss:$8 sps:$4 sm:$0xff]  }
  0x3b   :  { %540 = vmatprep.subr.bf16.mxu0 %v978_v45  ;;  %v994_v11 = vld [vmem:[%s1417_s6 + $0x70] ss:$8 sps:$4 sm:$0xff]   ;;  %v997_v12 = vld [vmem:[%s1419_s8 + $0x40] sm:$0xff]  }
  0x3c   :  { %392 = vmatpush1.bf16.msra.mxu1 %v939_v20  ;;  %v211_v13 = vld [vmem:[#allocation5] sm:$0x3]  ;;  %v1010_v43 = vld [vmem:[%s1419_s8 + $0x30] sm:$0xff]   ;;  %v1011_v44 = vld [vmem:[%s1419_s8 + $0x78] sm:$0xff]  }
  0x3d   :  { %393 = vmatprep.subr.bf16.mxu1 %v940_v21  ;;  %v216_v14 = vrot.slane %v211_v13, %v1269_v49  ;;  %v220_v15 = vrot.slane %v211_v13, %v1274_v51  ;;  %v1012_v45 = vld [vmem:[%s1419_s8 + $0x38] sm:$0xff]  }
  0x3e   :  { %541 = vmatpush1.bf16.msra.mxu0 %v976_v46  ;;  %v446_v46 = vld [vmem:[%s1418_s7] sm:$0x3] }
  0x3f   :  { %542 = vmatprep.subr.bf16.mxu0 %v981_v0  ;;  %v451_v47 = vrot.slane %v446_v46, %v1269_v49  ;;  %v455_v48 = vrot.slane %v446_v46, %v1274_v51 }
  0x40   :  { %394 = vmatpush1.bf16.msra.mxu1 %v942_v22 }
  0x41   :  { %395 = vmatprep.subr.bf16.mxu1 %v943_v23 }
  0x42   :  { %543 = vmatpush1.bf16.msra.mxu0 %v979_v1 }
  0x43   :  { %544 = vmatprep.subr.bf16.mxu0 %v984_v2 }
  0x44   :  { %396 = vmatpush1.bf16.msra.mxu1 %v945_v24 }
  0x45   :  { %397 = vmatprep.subr.bf16.mxu1 %v946_v25 }
  0x46   :  { %545 = vmatpush1.bf16.msra.mxu0 %v982_v3 }
  0x47   :  { %546 = vmatprep.subr.bf16.mxu0 %v987_v4 }
  0x48   :  { %398 = vmatpush1.bf16.msra.mxu1 %v948_v26  ;;  %v69_v26 = vld [vmem:[%s1412_s1] sm:$0xff] }
  0x49   :  { %399 = vmatprep.subr.bf16.mxu1 %v949_v27 }
  0x4a   :  { %547 = vmatpush1.bf16.msra.mxu0 %v985_v5 }
  0x4b   :  { %548 = vmatprep.subr.bf16.mxu0 %v990_v6 }
  0x4c   :  { %400 = vmatpush1.bf16.msra.mxu1 %v951_v28 }
  0x4d   :  { %401 = vmatprep.subr.bf16.mxu1 %v952_v29 }
  0x4e   :  { %549 = vmatpush1.bf16.msra.mxu0 %v988_v7 }
  0x4f   :  { %550 = vmatprep.subr.bf16.mxu0 %v993_v8 }
  0x50   :  { %402 = vmatpush1.bf16.msra.mxu1 %v954_v30  ;;  %v998_v30 = vld [vmem:[%s1419_s8] sm:$0xff]  }
  0x51   :  { %403 = vmatprep.subr.bf16.mxu1 %v955_v31 }
  0x52   :  { %551 = vmatpush1.bf16.msra.mxu0 %v991_v9 }
  0x53   :  { %552 = vmatprep.subr.bf16.mxu0 %v996_v10 }
  0x54   :  { %404 = vmatpush1.bf16.msra.mxu1 %v957_v32  ;;  %v999_v32 = vld [vmem:[%s1419_s8 + $0x48] sm:$0xff]  }
  0x55   :  { %405 = vmatprep.subr.bf16.mxu1 %v958_v33  ;;  %v1000_v33 = vld [vmem:[%s1419_s8 + $0x8] sm:$0xff]  }
  0x56   :  { %553 = vmatpush1.bf16.msra.mxu0 %v994_v11 }
  0x57   :  { %883 = vmatprep.subr.bf16.mxu0 %v997_v12 }
  0x58   :  { %406 = vmatpush1.bf16.msra.mxu1 %v960_v34  ;;  %v1001_v34 = vld [vmem:[%s1419_s8 + $0x50] sm:$0xff]  }
  0x59   :  { %407 = vmatprep.subr.bf16.mxu1 %v961_v35  ;;  %v1002_v35 = vld [vmem:[%s1419_s8 + $0x10] sm:$0xff]  }
  0x5c   :  { %408 = vmatpush1.bf16.msra.mxu1 %v963_v36  ;;  %v1003_v36 = vld [vmem:[%s1419_s8 + $0x58] sm:$0xff]  }
  0x5d   :  { %409 = vmatprep.subr.bf16.mxu1 %v964_v37  ;;  %v1004_v37 = vld [vmem:[%s1419_s8 + $0x18] sm:$0xff]  }
  0x60   :  { %410 = vmatpush1.bf16.msra.mxu1 %v966_v38  ;;  %v1005_v38 = vld [vmem:[%s1419_s8 + $0x60] sm:$0xff]  }
  0x61   :  { %411 = vmatprep.subr.bf16.mxu1 %v967_v39  ;;  %v1006_v39 = vld [vmem:[%s1419_s8 + $0x20] sm:$0xff]  }
  0x64   :  { %412 = vmatpush1.bf16.msra.mxu1 %v969_v40  ;;  %v1007_v40 = vld [vmem:[%s1419_s8 + $0x68] sm:$0xff]  }
  0x65   :  { %413 = vmatprep.subr.bf16.mxu1 %v970_v41  ;;  %v1008_v41 = vld [vmem:[%s1419_s8 + $0x28] sm:$0xff]  }
  0x68   :  { %414 = vmatpush1.bf16.msra.mxu1 %v972_v42  ;;  %v1009_v42 = vld [vmem:[%s1419_s8 + $0x70] sm:$0xff]   ;;  %s1138_s8 = smov [#allocation8]  }
  0x69   :  { %s782_s25 = sshll.u32 %s1138_s8, 4  ;;  %s783_s25 = int_to_ptr.vmem [resolvable:$true] %s782_s25 }
  0x6a   :  { %s1059_s7 = scalar_lea.vmem %s783_s25, 64  ;;  %p1064_p3 = scmp.lt.s32.totalorder %s783_s25, %s783_s25 }
  0x6b   :  { %p1060_p2 = scmp.ne.s32.totalorder %s783_s25, %s1059_s7  ;;  %p1065_p4 = scmp.lt.s32.totalorder %s1059_s7, %s1059_s7 }
  0x6d   :  { %p1066_p5 = por %p1065_p4, %p1064_p3 }
  0x6f   :  { %p1067_p6 = pnand %p1066_p5, %p1060_p2 }
 0x10b   :  { %v168_v54 = vpop.f32.mrb[0].mxu0 }
 0x10c   :  { %v169_v55 = vadd.f32 %v168_v54, %v83_v52  ;;  %v170_v56 = vpop.f32.mrb[1].mxu0 }
 0x10d   :  { %v171_v57 = vadd.f32 %v170_v56, %v87_v53  ;;  %v172_v58 = vpop.f32.mrb[2].mxu0 }
 0x10e   :  { %v175_v59 = vmax.f32 %v169_v55, 0.0  ;;  %v173_v60 = vpop.f32.mrb[3].mxu0 }
 0x10f   :  { %v176_v61 = vmax.f32 %v171_v57, 0.0 }
 0x110   :  { %v177_v63 = vpack.c.bf16 %v175_v59, %v175_v59 }
 0x111   :  { %v178_v62 = vpack.c.bf16 %v176_v61, %v176_v61 }
 0x113   :  { %415 = vmatprep.mubr.bf16.mxu1 %v178_v62 }
 0x114   :  { %416 = vmatmul.mubr.bf16.vlgmr.msra.gmra.mrb[0].mxu1 %v177_v63 }
 0x1e7   :  { %v417_v16 = vpop.f32.mrb[0].mxu1 }
 0x1e8   :  { %v418_v17 = vadd.f32 %v417_v16, %v216_v14  ;;  %v419_v18 = vpop.f32.mrb[1].mxu1 }
 0x1e9   :  { %v420_v19 = vadd.f32 %v419_v18, %v220_v15  ;;  %v421_v20 = vpop.f32.mrb[2].mxu1 }
 0x1ea   :  { %v762_v21 = vpack.c.bf16 %v418_v17, %v418_v17  ;;  %v422_v22 = vpop.f32.mrb[3].mxu1 }
 0x1eb   :  { %v424_v23 = vmul.f32 0.5, %v420_v19  ;;  %v764_v24 = vpack.c.bf16 %v420_v19, %v420_v19 }
 0x1ec   :  { %763 = vst [vmem:[#allocation8] sm:$0xf] %v762_v21 }
 0x1ed   :  { %v425_v25 = vmul.f32 1.442695, %v424_v23  ;;  %765 = vst [vmem:[#allocation10] sm:$0xf] %v764_v24 }
 0x1ef   :  { %1013 = vpow2.f32 %v425_v25 }
 0x1f9   :  { %v1014_v27 = vpop.eup %1013 }
 0x1fa   :  { %v427_v28 = vmul.f32 %v1014_v27, %v69_v26 }
 0x1fc   :  { %v428_v29 = vadd.f32 %v427_v28, %v418_v17 }
 0x1fe   :  { %v429_v31 = vpack.c.bf16 %v428_v29, %v428_v29 }
 0x200   :  { %571 = vmatmul.mubr.bf16.vlgmr.msra.gmra.mrb[4].mxu0 %v429_v31 }
 0x201   :  { %884 = vmatpush3.bf16.msra.mxu0 %v998_v30 }
 0x202   :  { %885 = vmatprep.subr.bf16.mxu0 %v999_v32 }
 0x205   :  { %886 = vmatpush3.bf16.msra.mxu0 %v1000_v33 }
 0x206   :  { %887 = vmatprep.subr.bf16.mxu0 %v1001_v34 }
 0x209   :  { %888 = vmatpush3.bf16.msra.mxu0 %v1002_v35 }
 0x20a   :  { %889 = vmatprep.subr.bf16.mxu0 %v1003_v36 }
 0x20d   :  { %890 = vmatpush3.bf16.msra.mxu0 %v1004_v37 }
 0x20e   :  { %891 = vmatprep.subr.bf16.mxu0 %v1005_v38 }
 0x211   :  { %892 = vmatpush3.bf16.msra.mxu0 %v1006_v39 }
 0x212   :  { %893 = vmatprep.subr.bf16.mxu0 %v1007_v40 }
 0x215   :  { %894 = vmatpush3.bf16.msra.mxu0 %v1008_v41 }
 0x216   :  { %895 = vmatprep.subr.bf16.mxu0 %v1009_v42 }
 0x219   :  { %896 = vmatpush3.bf16.msra.mxu0 %v1010_v43 }
 0x21a   :  { %897 = vmatprep.subr.bf16.mxu0 %v1011_v44 }
 0x21d   :  { %898 = vmatpush3.bf16.msra.mxu0 %v1012_v45 }
 0x2d3   :  { %v572_v50 = vpop.f32.mrb[4].mxu0 }
 0x2d4   :  { %v573_v52 = vadd.f32 %v572_v50, %v451_v47  ;;  %v574_v53 = vpop.f32.mrb[5].mxu0 }
 0x2d5   :  { %v575_v54 = vadd.f32 %v574_v53, %v455_v48  ;;  %v576_v55 = vpop.f32.mrb[6].mxu0 }
 0x2d6   :  { %v579_v56 = vmax.f32 %v573_v52, 0.0  ;;  %v577_v57 = vpop.f32.mrb[7].mxu0 }
 0x2d7   :  { %v580_v58 = vmax.f32 %v575_v54, 0.0 }
 0x2d8   :  { %v581_v60 = vpack.c.bf16 %v579_v56, %v579_v56 }
 0x2d9   :  { %v582_v59 = vpack.c.bf16 %v580_v58, %v580_v58 }
 0x2db   :  { %750 = vmatprep.mubr.bf16.mxu0 %v582_v59 }
 0x2dc   :  { %751 = vmatmul.mubr.bf16.vlgmr.msra.gmra.mrb[8].mxu0 %v581_v60 }
 0x2dd   :  { %1070 = shalt.err (!%p1067_p6)
}
 0x2de   :  { %s1071_s0 = scalar_lea.hbm %s1422_s11, 64 }
 0x2df   :  { %p1072_p7 = scmp.ne.s32.totalorder %s1422_s11, %s1071_s0  ;;  %p1075_p8 = scmp.lt.u32.totalorder %s1071_s0, %s1422_s11 }
 0x2e1   :  { %p1077_p9 = pnand %p1075_p8, %p1072_p7 }
 0x2e3   :  { %1080 = shalt.err (!%p1077_p9)
}
 0x2e4   :  { %785 = dma.vmem_to_hbm [thread:$0]  %s783_s25, 64, %s1422_s11, [#allocation9]  }
 0x2e5   :  { %s1139_s13 = smov [#allocation10]  }
 0x2e6   :  { %s792_s14 = sshll.u32 %s1139_s13, 4  ;;  %s793_s14 = int_to_ptr.vmem [resolvable:$true] %s792_s14 }
 0x2e7   :  { %s1081_s15 = scalar_lea.vmem %s793_s14, 64  ;;  %p1086_p11 = scmp.lt.s32.totalorder %s793_s14, %s793_s14 }
 0x2e8   :  { %p1082_p10 = scmp.ne.s32.totalorder %s793_s14, %s1081_s15  ;;  %p1087_p12 = scmp.lt.s32.totalorder %s1081_s15, %s1081_s15 }
 0x2ea   :  { %p1088_p13 = por %p1087_p12, %p1086_p11 }
 0x2ec   :  { %p1089_p0 = pnand %p1088_p13, %p1082_p10 }
 0x2ee   :  { %1092 = shalt.err (!%p1089_p0)
}
 0x2ef   :  { %s1093_s16 = scalar_lea.hbm %s1423_s12, 64 }
 0x2f0   :  { %p1094_p1 = scmp.ne.s32.totalorder %s1423_s12, %s1093_s16  ;;  %p1097_p2 = scmp.lt.u32.totalorder %s1093_s16, %s1423_s12 }
 0x2f2   :  { %p1099_p3 = pnand %p1097_p2, %p1094_p1 }
 0x2f4   :  { %1102 = shalt.err (!%p1099_p3)
}
 0x2f5   :  { %795 = dma.vmem_to_hbm [thread:$0]  %s793_s14, 64, %s1423_s12, [#allocation9]   ;;  %v866_v51 = vld [vmem:[%s1420_s9] ss:$0 sm:$0xff]  ;;  %vm760_vm1 = vcmask 519168  }
 0x2f6   :  { %s1140_s24 = smov [#allocation7]  }
 0x2f7   :  { %s772_s1 = sshll.u32 %s1140_s24, 4  ;;  %s773_s1 = int_to_ptr.vmem [resolvable:$true] %s772_s1 }
 0x2f8   :  { %s1103_s8 = scalar_lea.vmem %s773_s1, 64  ;;  %p1108_p5 = scmp.lt.s32.totalorder %s773_s1, %s773_s1 }
 0x2f9   :  { %p1104_p4 = scmp.ne.s32.totalorder %s773_s1, %s1103_s8  ;;  %p1109_p6 = scmp.lt.s32.totalorder %s1103_s8, %s1103_s8 }
 0x2fb   :  { %p1110_p7 = por %p1109_p6, %p1108_p5 }
 0x2fd   :  { %p1111_p8 = pnand %p1110_p7, %p1104_p4 }
 0x3af   :  { %v899_v49 = vpop.f32.mrb[8].mxu0 }
 0x3b0   :  { %v900_v61 = vpop.f32.mrb[9].mxu0 }
 0x3b1   :  { %v901_v62 = vadd.f32 %v900_v61, %v899_v49  ;;  %v902_v63 = vpop.f32.mrb[10].mxu0 }
 0x3b2   :  { %v903_v0 = vpop.f32.mrb[11].mxu0 }
 0x3b3   :  { %v753_v1 = vadd.f32 %v901_v62, %v866_v51 }
 0x3b5   :  { %v758_v2 = vmax.f32 %v753_v1, 0.0 }
 0x3b7   :  { %v759_v3 = vpack.c.bf16 %v758_v2, %v758_v2 }
 0x3b9   :  { %761 = vst.msk [vmem:[#allocation7] sm:$0xf] %vm760_vm1, %v759_v3 }
 0x3ba   :  { %1114 = shalt.err (!%p1111_p8)
}
 0x3bb   :  { %s1115_s25 = scalar_lea.hbm %s1421_s10, 64 }
 0x3bc   :  { %p1116_p9 = scmp.ne.s32.totalorder %s1421_s10, %s1115_s25  ;;  %p1119_p10 = scmp.lt.u32.totalorder %s1115_s25, %s1421_s10 }
 0x3be   :  { %p1121_p11 = pnand %p1119_p10, %p1116_p9 }
 0x3c0   :  { %1124 = shalt.err (!%p1121_p11)
}
 0x3c1   :  { %775 = dma.vmem_to_hbm [thread:$0]  %s773_s1, 64, %s1421_s10, [#allocation4]  }
 0x3c2   :  { %1129 = dma.done.wait [#allocation4], 64  }
 0x3c3   :  { %1130 = vsyncadd [#allocation4], 4294967232 }
 0x3c4   :  { %1131 = dma.done.wait [#allocation9], 128  }
 0x3c5   :  { %1132 = vsyncadd [#allocation9], 4294967168 }
 0x3c6   :  { %805 = vsyncpa [#allocation3], 1 }
 0x3c7   :  { %806 = vsyncpa [#allocation6], 1 }
 0x3c8   :  { %807 = vsyncpa [#allocation4], 1 }
 0x3c9   :  { %808 = vsyncpa [#allocation9], 1 }

</bundles_post_ra>
